<compile_context>
chip_gen: v6e
topology: v6e:2x2x1
jax: 0.10.0
libtpu: 0.0.40
codegen_flags: <defaults>
</compile_context>

<pallas_src>
import functools

import jax
import jax.numpy as jnp
from jax.experimental import pallas as pl
from jax.experimental.pallas import tpu as pltpu

EPS = 1e-8  # same eps as torch.nn.functional.cosine_similarity


def _cosine_loss_kernel(p_ref, t_ref, o_ref, *acc_refs,
                        total_rows, total_cols, tile_b, tile_d, num_d):
    i = pl.program_id(0)

    p = p_ref[...].astype(jnp.float32)
    t = t_ref[...].astype(jnp.float32)

    if num_d > 1 and total_cols % tile_d != 0:
        # Tail D tile: select padded columns to zero BEFORE any arithmetic so
        # garbage never reaches the products (select, not arithmetic masking).
        k = pl.program_id(1)
        col = k * tile_d + jax.lax.broadcasted_iota(jnp.int32, p.shape, 1)
        cmask = col < total_cols
        p = jnp.where(cmask, p, 0.0)
        t = jnp.where(cmask, t, 0.0)

    # Per-row reductions along the feature (lane) axis.
    # TODO(synk): if profiling shows the 2 XLU units as the binding slot on
    # v7x for small D, offload these lane reductions to the idle MXU via
    # (p * t) @ ones((tile_d, 1)) instead of cross-lane sums.
    dot = jnp.sum(p * t, axis=1, keepdims=True)   # (tile_b, 1)
    pn2 = jnp.sum(p * p, axis=1, keepdims=True)   # (tile_b, 1)
    tn2 = jnp.sum(t * t, axis=1, keepdims=True)   # (tile_b, 1)

    def finalize(dot_v, pn2_v, tn2_v):
        # cos = dot * rsqrt(clamp_min(|p|^2*|t|^2, eps^2))  (EUP rsqrt).
        inv = jax.lax.rsqrt(jnp.maximum(pn2_v * tn2_v, jnp.float32(EPS * EPS)))
        cos = dot_v * inv                                    # (tile_b, 1)
        # Mask rows past the true batch size (tail tile).  Keep as a select so
        # NaN/Inf produced by garbage rows is discarded, not propagated.
        row = i * tile_b + jax.lax.broadcasted_iota(jnp.int32, cos.shape, 0)
        contrib = jnp.where(row < total_rows, 1.0 - cos, 0.0)
        partial = jnp.sum(contrib)
        # One partial sum per batch tile, written to a lane-dense (1,1,128) block.
        o_ref[...] = jnp.broadcast_to(partial, o_ref.shape).astype(jnp.float32)

    if num_d == 1:
        # Common case: whole feature dim in one block; no accumulator traffic.
        finalize(dot, pn2, tn2)
    else:
        dot_acc, pn2_acc, tn2_acc = acc_refs
        k = pl.program_id(1)

        @pl.when(k == 0)
        def _():
            dot_acc[...] = jnp.zeros_like(dot_acc)
            pn2_acc[...] = jnp.zeros_like(pn2_acc)
            tn2_acc[...] = jnp.zeros_like(tn2_acc)

        dot_acc[...] += dot
        pn2_acc[...] += pn2
        tn2_acc[...] += tn2

        @pl.when(k == num_d - 1)
        def _():
            finalize(dot_acc[...], pn2_acc[...], tn2_acc[...])


def _vmem_capacity_bytes():
    try:
        return int(pltpu.get_tpu_info().vmem_capacity_bytes)
    except Exception:
        return 64 * 1024 * 1024   # conservative fallback (v7x-sized VMEM)


def _round_up(x, m):
    return ((x + m - 1) // m) * m


def _choose_tiles(batch, dim, itemsize):
    """Returns (tile_b, tile_d, vmem_cap_bytes, per_block_cost)."""
    vmem = _vmem_capacity_bytes()
    if vmem >= 96 * 1024 * 1024:
        # v5e / v6e: 128 MiB VMEM — purely HBM-bound, big blocks nearly free.
        vmem_cap = 100 * 1024 * 1024
    else:
        # v7x: 64 MiB physical — stay <= ~56 MiB for compiler-scratch headroom.
        vmem_cap = 56 * 1024 * 1024

    # Per-input-block cost model: 2 inputs x 2 pipeline buffers of the raw
    # block + ~3 f32-sized in-kernel temporaries (upcast copies / products).
    f32_ratio = 4.0 / itemsize
    per_block_cost = 4.0 + 3.0 * f32_ratio
    block_budget = int((vmem_cap - (4 << 20)) / per_block_cost)
    block_budget = max(min(block_budget, 12 * 1024 * 1024), 1 << 20)

    row_bytes = dim * itemsize
    b_pad = _round_up(batch, 16)

    if 16 * row_bytes <= block_budget:
        # Full rows fit in one block: single D tile, as many rows as budgeted.
        tile_d = dim
        tile_b = max((block_budget // row_bytes) // 16 * 16, 16)
        tile_b = min(tile_b, b_pad)
        # Keep >= 2 batch tiles so v7x's two TensorCores both get work
        # (harmless on single-core v5e/v6e).
        if batch > 16 and pl.cdiv(batch, tile_b) < 2:
            tile_b = min(tile_b, _round_up(pl.cdiv(batch, 2), 16))
    else:
        # Very large feature dim: split D along a trailing "arbitrary" axis.
        tile_b = 16
        tile_d = max((block_budget // (16 * itemsize)) // 128 * 128, 128)
        tile_d = min(tile_d, _round_up(dim, 128))

    return tile_b, tile_d, vmem_cap, per_block_cost


def cosine_similarity_loss(predictions, targets, *, tile_b=None, tile_d=None):
    assert predictions.shape == targets.shape
    assert predictions.ndim == 2, "expected (batch, dim) inputs"
    B, D = predictions.shape
    itemsize = jnp.dtype(predictions.dtype).itemsize

    auto_b, auto_d, vmem_cap, per_block_cost = _choose_tiles(B, D, itemsize)
    tile_b = auto_b if tile_b is None else tile_b
    tile_d = auto_d if tile_d is None else tile_d

    num_b = pl.cdiv(B, tile_b)
    num_d = pl.cdiv(D, tile_d)

    kernel = functools.partial(
        _cosine_loss_kernel, total_rows=B, total_cols=D,
        tile_b=tile_b, tile_d=tile_d, num_d=num_d)

    block_bytes = tile_b * tile_d * itemsize
    vmem_limit = int(min(vmem_cap,
                         max(32 * 1024 * 1024,
                             int(per_block_cost * block_bytes) + (4 << 20))))

    scratch_shapes = []
    if num_d > 1:
        scratch_shapes = [pltpu.VMEM((tile_b, 1), jnp.float32)] * 3

    partials = pl.pallas_call(
        kernel,
        out_shape=jax.ShapeDtypeStruct((num_b, 1, 128), jnp.float32),
        grid_spec=pltpu.PrefetchScalarGridSpec(
            num_scalar_prefetch=0,
            grid=(num_b, num_d),
            in_specs=[
                pl.BlockSpec((tile_b, tile_d), lambda i, k: (i, k)),
                pl.BlockSpec((tile_b, tile_d), lambda i, k: (i, k)),
            ],
            out_specs=pl.BlockSpec((1, 1, 128), lambda i, k: (i, 0, 0)),
            scratch_shapes=scratch_shapes,
        ),
        compiler_params=pltpu.CompilerParams(
            dimension_semantics=("parallel", "arbitrary"),
            vmem_limit_bytes=vmem_limit,
        ),
    )(predictions, targets)

    # Tiny final reduction (num_b scalars) + mean in plain JAX.
    return jnp.sum(partials[:, 0, 0]) / jnp.float32(B)


def _reference(predictions, targets):
    p = predictions.astype(jnp.float32)
    t = targets.astype(jnp.float32)
    dot = jnp.sum(p * t, axis=1)
    denom = jnp.maximum(
        jnp.linalg.norm(p, axis=1) * jnp.linalg.norm(t, axis=1), EPS
    )
    cos = dot / denom
    return jnp.mean(1.0 - cos)


if __name__ == "__main__":
    key = jax.random.PRNGKey(0)
    k1, k2, k3, k4, k5, k6 = jax.random.split(key, 6)

    # Small (batch, dim) shapes consistent with the module's forward.
    batch, dim = 16, 128
    predictions = jax.random.normal(k1, (batch, dim), dtype=jnp.float32)
    targets = jax.random.normal(k2, (batch, dim), dtype=jnp.float32)
    loss = jax.block_until_ready(cosine_similarity_loss(predictions, targets))
    ref = _reference(predictions, targets)
    assert jnp.allclose(loss, ref, rtol=1e-5, atol=1e-5), (loss, ref)

    # Ragged batch: multi-tile parallel output + masked tail batch tile.
    p2 = jax.random.normal(k3, (20, dim), dtype=jnp.float32)
    t2 = jax.random.normal(k4, (20, dim), dtype=jnp.float32)
    loss2 = jax.block_until_ready(cosine_similarity_loss(p2, t2, tile_b=16))
    ref2 = _reference(p2, t2)
    assert jnp.allclose(loss2, ref2, rtol=1e-5, atol=1e-5), (loss2, ref2)

    # Split-D path: trailing "arbitrary" D axis with accumulators, column mask
    # on the ragged last D tile, and masked tail batch tile.
    p3 = jax.random.normal(k5, (24, 384), dtype=jnp.float32)
    t3 = jax.random.normal(k6, (24, 384), dtype=jnp.float32)
    loss3 = jax.block_until_ready(
        cosine_similarity_loss(p3, t3, tile_b=16, tile_d=256))
    ref3 = _reference(p3, t3)
    assert jnp.allclose(loss3, ref3, rtol=1e-5, atol=1e-5), (loss3, ref3)

    print("KERNEL_OK")
</pallas_src>

<mosaic_0001>
module attributes {stable_mosaic.version = 11 : i64} {
  func.func @_cosine_loss_kernel(%arg0: i32, %arg1: i32, %arg2: memref<16x128xf32, #tpu.memory_space<vmem>>, %arg3: memref<16x128xf32, #tpu.memory_space<vmem>>, %arg4: memref<1x1x128xf32, #tpu.memory_space<vmem>>) attributes {dimension_semantics = [#tpu.dimension_semantics<parallel>, #tpu.dimension_semantics<arbitrary>], iteration_bounds = array<i64: 1, 1>, scalar_prefetch = 0 : i64, scratch_operands = 0 : i64, tpu.core_type = #tpu.core_type<tc>, window_params = [{transform_indices = @transform_0, window_bounds = array<i64: 16, 128>}, {transform_indices = @transform_1, window_bounds = array<i64: 16, 128>}, {transform_indices = @transform_2, window_bounds = array<i64: 1, 1, 128>}]} {
    %c0 = arith.constant 0 : index
    %c0_0 = arith.constant 0 : index
    %0 = vector.load %arg2[%c0, %c0_0] : memref<16x128xf32, #tpu.memory_space<vmem>>, vector<16x128xf32>
    %c0_1 = arith.constant 0 : index
    %c0_2 = arith.constant 0 : index
    %1 = vector.load %arg3[%c0_1, %c0_2] : memref<16x128xf32, #tpu.memory_space<vmem>>, vector<16x128xf32>
    %2 = arith.mulf %0, %1 : vector<16x128xf32>
    %cst = arith.constant dense<0.000000e+00> : vector<16xf32>
    %3 = vector.multi_reduction <add>, %2, %cst [1] : vector<16x128xf32> to vector<16xf32>
    %4 = vector.shape_cast %3 : vector<16xf32> to vector<16x1xf32>
    %5 = arith.mulf %0, %0 : vector<16x128xf32>
    %cst_3 = arith.constant dense<0.000000e+00> : vector<16xf32>
    %6 = vector.multi_reduction <add>, %5, %cst_3 [1] : vector<16x128xf32> to vector<16xf32>
    %7 = vector.shape_cast %6 : vector<16xf32> to vector<16x1xf32>
    %8 = arith.mulf %1, %1 : vector<16x128xf32>
    %cst_4 = arith.constant dense<0.000000e+00> : vector<16xf32>
    %9 = vector.multi_reduction <add>, %8, %cst_4 [1] : vector<16x128xf32> to vector<16xf32>
    %10 = vector.shape_cast %9 : vector<16xf32> to vector<16x1xf32>
    %11 = arith.mulf %7, %10 : vector<16x1xf32>
    %cst_5 = arith.constant 1.000000e-16 : f32
    %12 = vector.broadcast %cst_5 : f32 to vector<16x1xf32>
    %13 = arith.maximumf %11, %12 : vector<16x1xf32>
    %14 = math.rsqrt %13 : vector<16x1xf32>
    %15 = arith.mulf %4, %14 : vector<16x1xf32>
    %c16_i32 = arith.constant 16 : i32
    %16 = arith.muli %arg0, %c16_i32 : i32
    %17 = tpu.iota {dimensions = array<i32: 0>} : vector<16x1xi32>
    %18 = vector.broadcast %16 : i32 to vector<16x1xi32>
    %19 = arith.addi %18, %17 : vector<16x1xi32>
    %c16_i32_6 = arith.constant 16 : i32
    %20 = vector.broadcast %c16_i32_6 : i32 to vector<16x1xi32>
    %21 = arith.cmpi slt, %19, %20 : vector<16x1xi32>
    %cst_7 = arith.constant 1.000000e+00 : f32
    %22 = vector.broadcast %cst_7 : f32 to vector<16x1xf32>
    %23 = arith.subf %22, %15 : vector<16x1xf32>
    %cst_8 = arith.constant 0.000000e+00 : f32
    %24 = vector.broadcast %cst_8 : f32 to vector<16x1xf32>
    %25 = arith.select %21, %23, %24 : vector<16x1xi1>, vector<16x1xf32>
    %26 = vector.shape_cast %25 : vector<16x1xf32> to vector<1x16x1xf32>
    %cst_9 = arith.constant dense<0.000000e+00> : vector<1xf32>
    %27 = vector.multi_reduction <add>, %26, %cst_9 [1, 2] : vector<1x16x1xf32> to vector<1xf32>
    %28 = vector.shape_cast %27 : vector<1xf32> to vector<1x1x1xf32>
    %29 = vector.extract %28[0, 0, 0] : f32 from vector<1x1x1xf32>
    %30 = vector.broadcast %29 : f32 to vector<1x1x128xf32>
    %c0_10 = arith.constant 0 : index
    %c0_11 = arith.constant 0 : index
    %c0_12 = arith.constant 0 : index
    %31 = vector.load %arg4[%c0_10, %c0_11, %c0_12] : memref<1x1x128xf32, #tpu.memory_space<vmem>>, vector<1x1x128xf32>
    tpu.vector_store %arg4[%c0_10, %c0_11, %c0_12], %30 {strides = array<i32>} : memref<1x1x128xf32, #tpu.memory_space<vmem>>, vector<1x1x128xf32>,
    return
  }
  func.func @transform_0(%arg0: i32, %arg1: i32) -> (i32, i32) {
    %c0_i32 = arith.constant 0 : i32
    return %arg0, %arg1 : i32, i32
  }
  func.func @transform_1(%arg0: i32, %arg1: i32) -> (i32, i32) {
    %c0_i32 = arith.constant 0 : i32
    return %arg0, %arg1 : i32, i32
  }
  func.func @transform_2(%arg0: i32, %arg1: i32) -> (i32, i32, i32) {
    %c0_i32 = arith.constant 0 : i32
    %c0_i32_0 = arith.constant 0 : i32
    %c0_i32_1 = arith.constant 0 : i32
    return %arg0, %c0_i32, %c0_i32_0 : i32, i32, i32
  }
}

</mosaic_0001>

<bundles_post_ra>
// kernel: tpu_custom_call.1
= control target key start
LH: loop header
LB: loop body
LE: loop exit
PB: predicated region body
PF: predicated region fallthrough
CT: control target
= control target key end

     0   :  { %7 = vsyncpa [#allocation3], 0  ;;  %s220_s0 = inlined_call_operand.hbm [shape: f32[16,128], index: 0, kind: input, shape index: {}]   ;;  %s221_s1 = inlined_call_operand.hbm [shape: f32[16,128], index: 1, kind: input, shape index: {}]   ;;  %s222_s2 = inlined_call_operand.hbm [shape: f32[1,1,128], index: 2, kind: output, shape index: {}]  }
   0x1   :  { %8 = vsyncpa [#allocation6], 0 }
   0x2   :  { %9 = vsyncpa [#allocation4], 0  ;;  %s191_s9 = smov [#allocation2]  }
   0x3   :  { %s15_s10 = sshll.u32 %s191_s9, 4  ;;  %s16_s10 = int_to_ptr.vmem [resolvable:$true] %s15_s10 }
   0x4   :  { %s133_s11 = scalar_lea.vmem %s16_s10, 256  ;;  %p138_p1 = scmp.lt.s32.totalorder %s16_s10, %s16_s10 }
   0x5   :  { %p134_p0 = scmp.ne.s32.totalorder %s16_s10, %s133_s11  ;;  %p139_p2 = scmp.lt.s32.totalorder %s133_s11, %s133_s11 }
   0x7   :  { %p140_p3 = por %p139_p2, %p138_p1 }
   0x9   :  { %p141_p4 = pnand %p140_p3, %p134_p0 }
   0xb   :  { %144 = shalt.err (!%p141_p4)
}
   0xc   :  { %s192_s12 = smov 128   ;;  %s193_s13 = smov 8  }
   0xd   :  { %21 = dma.hbm_to_vmem [thread:$0]  %s220_s0, 256, %s16_s10, [#allocation3], %s192_s12, %s192_s12, %s193_s13  }
   0xe   :  { %s194_s16 = smov [#allocation5]  }
   0xf   :  { %s27_s17 = sshll.u32 %s194_s16, 4  ;;  %s28_s17 = int_to_ptr.vmem [resolvable:$true] %s27_s17 }
  0x10   :  { %s153_s18 = scalar_lea.vmem %s28_s17, 256  ;;  %p158_p6 = scmp.lt.s32.totalorder %s28_s17, %s28_s17 }
  0x11   :  { %p154_p5 = scmp.ne.s32.totalorder %s28_s17, %s153_s18  ;;  %p159_p7 = scmp.lt.s32.totalorder %s153_s18, %s153_s18 }
  0x13   :  { %p160_p8 = por %p159_p7, %p158_p6 }
  0x15   :  { %p161_p9 = pnand %p160_p8, %p154_p5 }
  0x17   :  { %164 = shalt.err (!%p161_p9)
}
  0x18   :  { %33 = dma.hbm_to_vmem [thread:$0]  %s221_s1, 256, %s28_s17, [#allocation6], %s192_s12, %s192_s12, %s193_s13  }
  0x19   :  { %185 = dma.done.wait [#allocation3], 256  }
  0x1a   :  { %186 = vsyncadd [#allocation3], 4294967040 }
  0x1b   :  { %187 = dma.done.wait [#allocation6], 256  }
  0x1c   :  { %188 = vsyncadd [#allocation6], 4294967040  ;;  %v42_v0 = vld [vmem:[#allocation5] sm:$0xff]  ;;  %v40_v1 = vld [vmem:[#allocation2] sm:$0xff]  ;;  %vm83_vm0 = vcmask 7168   ;;  %s195_s0 = smov [#allocation7]  }
  0x1d   :  { %v43_v2 = vld [vmem:[#allocation5 + $0x8] sm:$0xff]  ;;  %v56_v3 = vmul.f32 %v42_v0, %v42_v0  ;;  %v50_v4 = vmul.f32 %v40_v1, %v40_v1  ;;  %v41_v5 = vld [vmem:[#allocation2 + $0x8] sm:$0xff]  ;;  %v44_v8 = vmul.f32 %v42_v0, %v40_v1  ;;  %s104_s1 = sshll.u32 %s195_s0, 4  ;;  %s105_s1 = int_to_ptr.vmem [resolvable:$true] %s104_s1 }
  0x1e   :  { %v57_v6 = vmul.f32 %v43_v2, %v43_v2  ;;  %v51_v7 = vmul.f32 %v41_v5, %v41_v5  ;;  %v45_v9 = vmul.f32 %v43_v2, %v41_v5  ;;  %s165_s22 = scalar_lea.vmem %s105_s1, 16  ;;  %s169_s23 = scalar_lea.vmem %s105_s1, 32 }
  0x1f   :  { %58 = vadd.xlane.f32.xlu1 %v56_v3  ;;  %52 = vadd.xlane.f32.xlu0 %v50_v4  ;;  %p166_p10 = scmp.ne.s32.totalorder %s105_s1, %s165_s22  ;;  %p170_p11 = scmp.lt.s32.totalorder %s105_s1, %s105_s1 }
  0x20   :  { %p171_p12 = scmp.lt.s32.totalorder %s169_s23, %s165_s22 }
  0x22   :  { %p172_p13 = por %p171_p12, %p170_p11 }
  0x23   :  { %60 = vadd.xlane.f32.xlu1 %v57_v6  ;;  %54 = vadd.xlane.f32.xlu0 %v51_v7 }
  0x24   :  { %p173_p0 = pnand %p172_p13, %p166_p10 }
  0x27   :  { %46 = vadd.xlane.f32.xlu0 %v44_v8  ;;  %48 = vadd.xlane.f32.xlu1 %v45_v9 }
  0xa8   :  { %v59_v10 = vpop.xlane.xlu1 %58  ;;  %v53_v11 = vpop.xlane.xlu0 %52 }
  0xa9   :  { %v62_v12 = vmul.f32 %v59_v10, %v53_v11 }
  0xab   :  { %v64_v13 = vmax.f32 %v62_v12, 1e-16 }
  0xac   :  { %v61_v14 = vpop.xlane.xlu1 %60  ;;  %v55_v15 = vpop.xlane.xlu0 %54 }
  0xad   :  { %121 = vrsqrt.f32 %v64_v13  ;;  %v63_v16 = vmul.f32 %v61_v14, %v55_v15 }
  0xaf   :  { %v65_v17 = vmax.f32 %v63_v16, 1e-16 }
  0xb0   :  { %v47_v18 = vpop.xlane.xlu0 %46  ;;  %v49_v21 = vpop.xlane.xlu1 %48 }
  0xb1   :  { %123 = vrsqrt.f32 %v65_v17 }
  0xba   :  { %v122_v19 = vpop.eup %121 }
  0xbb   :  { %v68_v20 = vmul.f32 %v122_v19, %v47_v18 }
  0xbd   :  { %v79_v23 = vsub.f32 1.0, %v68_v20 }
  0xbe   :  { %v124_v22 = vpop.eup %123 }
  0xbf   :  { %v69_v24 = vmul.f32 %v124_v22, %v49_v21  ;;  %v84_v26 = vsel %vm83_vm0, %v79_v23, 0.0 }
  0xc1   :  { %v80_v25 = vsub.f32 1.0, %v69_v24 }
  0xc3   :  { %v85_v27 = vsel %vm83_vm0, %v80_v25, 0.0 }
  0xc4   :  { %v86_v28 = vadd.f32 %v85_v27, %v84_v26 }
  0xc6   :  { %87 = vadd.xlane.f32.xlu0 %v86_v28 }
 0x14f   :  { %v88_v29 = vpop.xlane.xlu0 %87 }
 0x150   :  { %v89_v30 = vrot.slane %v88_v29, 4 }
 0x152   :  { %v90_v31 = vadd.f32 %v89_v30, %v88_v29 }
 0x154   :  { %v91_v32 = vrot.slane %v90_v31, 2 }
 0x156   :  { %v92_v33 = vadd.f32 %v91_v32, %v90_v31 }
 0x158   :  { %v93_v34 = vrot.slane %v92_v33, 1 }
 0x15a   :  { %v94_v35 = vadd.f32 %v93_v34, %v92_v33 }
 0x15c   :  { %114 = vpush %v94_v35 }
 0x18d   :  { %s115_s21 = spop %114 }
 0x18e   :  { %v96_v36 = vstv %s115_s21 }
 0x18f   :  { %97 = vst [vmem:[#allocation7] sm:$0x1] %v96_v36 }
 0x190   :  { %176 = shalt.err (!%p173_p0)
}
 0x191   :  { %107 = dma.vmem_to_hbm [thread:$0]  %s105_s1, 16, %s222_s2, [#allocation4]  }
 0x192   :  { %189 = dma.done.wait [#allocation4], 16  }
 0x193   :  { %190 = vsyncadd [#allocation4], 4294967280 }
 0x194   :  { %111 = vsyncpa [#allocation3], 1 }
 0x195   :  { %112 = vsyncpa [#allocation6], 1 }
 0x196   :  { %113 = vsyncpa [#allocation4], 1 }

</bundles_post_ra>
